<compile_context>
chip_gen: v5e
topology: v5e:2x2
jax: 0.10.0
libtpu: 0.0.40
codegen_flags: <defaults>
</compile_context>

<pallas_src>
import functools
import math

import jax
import jax.numpy as jnp
from jax import lax
from jax.experimental import pallas as pl
from jax.experimental.pallas import tpu as pltpu


def _attention_kernel(x_ref, wqkv_ref, bqkv_ref, wp_ref, bp_ref, o_ref, attn_ref, *,
                      n_heads: int, head_dim: int):
    """One grid step = Bt batch elements: QKV projection + causal attention + out-proj."""
    Bt, T, C = x_ref.shape
    D = head_dim
    R = Bt * T

    # In-kernel bf16 cast of the activations; merge (Bt, T) rows for one big matmul.
    x = x_ref[...].reshape(R, C).astype(jnp.bfloat16)                      # (R, C) bf16

    # Fused QKV projection: single K=C, N=3C MXU matmul, f32 accumulate + f32 bias.
    # The 1/sqrt(D) scale is already folded into the Q columns / Q bias on the host.
    qkv = jnp.dot(x, wqkv_ref[...], preferred_element_type=jnp.float32) + bqkv_ref[0]
    qkv = qkv.astype(jnp.bfloat16).reshape(Bt, T, 3 * C)                   # (Bt, T, 3C)

    # Causal predicate built once (>= 2-D iota required on TPU), applied with one select
    # per head. Every causal row keeps its diagonal, so softmax never sees an all-masked row.
    row = lax.broadcasted_iota(jnp.int32, (1, T, T), 1)
    col = lax.broadcasted_iota(jnp.int32, (1, T, T), 2)
    keep = col <= row                                                      # (1, T, T) bool

    # Per-head attention; each head's output goes straight into the VMEM scratch
    # (no f32 accumulator carried across iterations of the unrolled Python loop).
    for h in range(n_heads):                                               # static, small
        q = qkv[:, :, 0 * C + h * D: 0 * C + (h + 1) * D]                  # (Bt, T, D) bf16
        k = qkv[:, :, 1 * C + h * D: 1 * C + (h + 1) * D]
        v = qkv[:, :, 2 * C + h * D: 2 * C + (h + 1) * D]

        # Batched over Bt; contracts last dims directly (no explicit transpose of k).
        s = jnp.einsum("bqd,bkd->bqk", q, k, preferred_element_type=jnp.float32)
        s = jnp.where(keep, s, -1e30)

        # Numerically-stable softmax in f32; approx reciprocal runs on the EUP slot.
        m = jnp.max(s, axis=-1, keepdims=True)
        e = jnp.exp(s - m)
        p = e * pl.reciprocal(jnp.sum(e, axis=-1, keepdims=True), approx=True)

        attn_ref[:, :, h * D:(h + 1) * D] = jnp.einsum(
            "bqk,bkd->bqd", p.astype(jnp.bfloat16), v,
            preferred_element_type=jnp.float32)                            # (Bt, T, D) f32

    # Single output projection over all heads: (R, C) @ (C, C), K = C on the MXU.
    attn = attn_ref[...].reshape(R, C).astype(jnp.bfloat16)
    out = jnp.dot(attn, wp_ref[...], preferred_element_type=jnp.float32) + bp_ref[0]
    o_ref[...] = out.reshape(Bt, T, C).astype(o_ref.dtype)


def _choose_block_batch(B, T, C):
    """Largest divisor of B whose per-step working set stays modest; amortizes the
    ~0.35 us per-grid-step overhead at small T, C. Requires T % 8 == 0 to merge batch
    rows onto the sublane axis losslessly."""
    if T % 8 != 0:
        return 1
    budget = 8 << 20  # bytes of per-step activation working set

    def work(bt):
        rows = bt * T
        return 4 * (rows * 3 * C) * 2 + 4 * bt * T * T * 3 + 4 * rows * C * 3

    bt = 1
    for cand in range(1, B + 1):
        if B % cand == 0 and work(cand) <= budget:
            bt = cand
            if cand * T >= 128:
                break
    return bt


def _vmem_limit_bytes(Bt, T, C):
    """Working-set-derived VMEM request, capped at 48 MiB so v7x (64 MiB physical per TC)
    keeps compiler headroom; floored at 32 MiB (<= default scoped limit everywhere)."""
    blk = Bt * T * C * 4
    est = (
        2 * blk                            # double-buffered x blocks (f32)
        + 2 * blk                          # double-buffered output blocks
        + blk                              # attention VMEM scratch (f32)
        + 2 * 2 * (3 * C * C + C * C)      # double-buffered bf16 weights
        + 2 * 4 * 4 * C                    # biases
        + Bt * T * 3 * C * 4 * 2           # qkv intermediates (f32 + bf16)
        + Bt * T * T * 4 * 3               # per-head scores / softmax temporaries
    )
    return int(min(48 * 2**20, max(32 * 2**20, 2 * est)))


def masked_causal_attention(x, params, *, n_heads):
    """x: (B, T, C).  params: PyTorch nn.Linear layout, W: (out, in), b: (out,)."""
    B, T, C = x.shape
    assert C % n_heads == 0
    D = C // n_heads
    scale = 1.0 / math.sqrt(D)

    # Host-side packing: fuse Q/K/V, pre-transpose so the kernel computes x @ W, and fold
    # the softmax scale into the Q columns / Q bias.
    wqkv_t = jnp.concatenate(
        [params["wq"].T * scale, params["wk"].T, params["wv"].T], axis=1
    ).astype(jnp.bfloat16)                                                   # (C, 3C)
    bqkv = jnp.concatenate(
        [params["bq"] * scale, params["bk"], params["bv"]]
    ).reshape(1, 3 * C).astype(jnp.float32)
    wp_t = params["wp"].T.astype(jnp.bfloat16)                               # (C, C)
    bp = params["bp"].reshape(1, C).astype(jnp.float32)

    Bt = _choose_block_batch(B, T, C)
    grid = (B // Bt,)

    kernel = functools.partial(_attention_kernel, n_heads=n_heads, head_dim=D)

    in_specs = [
        pl.BlockSpec((Bt, T, C), lambda b: (b, 0, 0)),   # x (kept in its original dtype)
        pl.BlockSpec((C, 3 * C), lambda b: (0, 0)),      # packed, pre-transposed W_qkv
        pl.BlockSpec((1, 3 * C), lambda b: (0, 0)),      # packed bias (f32)
        pl.BlockSpec((C, C), lambda b: (0, 0)),          # pre-transposed W_proj
        pl.BlockSpec((1, C), lambda b: (0, 0)),          # proj bias (f32)
    ]
    out_spec = pl.BlockSpec((Bt, T, C), lambda b: (b, 0, 0))

    return pl.pallas_call(
        kernel,
        out_shape=jax.ShapeDtypeStruct((B, T, C), x.dtype),
        grid_spec=pltpu.PrefetchScalarGridSpec(
            num_scalar_prefetch=0,
            grid=grid,
            in_specs=in_specs,
            out_specs=out_spec,
            scratch_shapes=[pltpu.VMEM((Bt, T, C), jnp.float32)],
        ),
        compiler_params=pltpu.CompilerParams(
            dimension_semantics=("parallel",),
            vmem_limit_bytes=_vmem_limit_bytes(Bt, T, C),
        ),
    )(x, wqkv_t, bqkv, wp_t, bp)


def _init_linear(key, in_dim, out_dim):
    """Deterministic init mimicking nn.Linear default (uniform +/- 1/sqrt(in))."""
    kw, kb = jax.random.split(key)
    bound = 1.0 / math.sqrt(in_dim)
    w = jax.random.uniform(kw, (out_dim, in_dim), jnp.float32, -bound, bound)
    b = jax.random.uniform(kb, (out_dim,), jnp.float32, -bound, bound)
    return w, b


def _reference(x, params, n_heads):
    """Pure-JAX f32 reference mirroring the PyTorch forward (dropout = identity)."""
    B, T, C = x.shape
    D = C // n_heads

    def lin(x, w, b):
        return x @ w.T + b

    q = lin(x, params["wq"], params["bq"]).reshape(B, T, n_heads, D).transpose(0, 2, 1, 3)
    k = lin(x, params["wk"], params["bk"]).reshape(B, T, n_heads, D).transpose(0, 2, 1, 3)
    v = lin(x, params["wv"], params["bv"]).reshape(B, T, n_heads, D).transpose(0, 2, 1, 3)

    w = jnp.einsum("bhqd,bhkd->bhqk", q, k) / math.sqrt(D)
    mask = jnp.tril(jnp.ones((T, T), dtype=bool))
    w = jnp.where(mask[None, None], w, -jnp.inf)
    p = jax.nn.softmax(w, axis=-1)
    a = jnp.einsum("bhqk,bhkd->bhqd", p, v)
    a = a.transpose(0, 2, 1, 3).reshape(B, T, C)
    return lin(a, params["wp"], params["bp"])


if __name__ == "__main__":
    # Small shapes consistent with the module: B=2, T=max_T=8, h_dim=32, n_heads=4.
    B, T, C, n_heads = 2, 8, 32, 4

    key = jax.random.PRNGKey(0)
    kx, kq, kk, kv, kp = jax.random.split(key, 5)

    x = jax.random.normal(kx, (B, T, C), jnp.float32)

    wq, bq = _init_linear(kq, C, C)
    wk, bk = _init_linear(kk, C, C)
    wv, bv = _init_linear(kv, C, C)
    wp, bp = _init_linear(kp, C, C)
    params = dict(wq=wq, bq=bq, wk=wk, bk=bk, wv=wv, bv=bv, wp=wp, bp=bp)

    out = masked_causal_attention(x, params, n_heads=n_heads)
    out = jax.block_until_ready(out)

    ref = _reference(x, params, n_heads)
    assert out.shape == (B, T, C)
    # bf16 MXU operands + approx reciprocal -> widened tolerance vs the pure-f32 reference.
    assert jnp.allclose(out, ref, atol=5e-2, rtol=5e-2), "mismatch vs reference"

    print("KERNEL_OK")
</pallas_src>

<mosaic_0001>
module attributes {stable_mosaic.version = 11 : i64} {
  func.func @_attention_kernel(%arg0: i32, %arg1: memref<2x8x32xf32, #tpu.memory_space<vmem>>, %arg2: memref<32x96xbf16, #tpu.memory_space<vmem>>, %arg3: memref<1x96xf32, #tpu.memory_space<vmem>>, %arg4: memref<32x32xbf16, #tpu.memory_space<vmem>>, %arg5: memref<1x32xf32, #tpu.memory_space<vmem>>, %arg6: memref<2x8x32xf32, #tpu.memory_space<vmem>>, %arg7: memref<2x8x32xf32, #tpu.memory_space<vmem>>) attributes {dimension_semantics = [#tpu.dimension_semantics<parallel>], iteration_bounds = array<i64: 1>, scalar_prefetch = 0 : i64, scratch_operands = 1 : i64, tpu.core_type = #tpu.core_type<tc>, window_params = [{transform_indices = @transform_0, window_bounds = array<i64: 2, 8, 32>}, {pipeline_mode = #tpu.pipeline_mode<synchronous>, transform_indices = @transform_1, window_bounds = array<i64: 32, 96>}, {pipeline_mode = #tpu.pipeline_mode<synchronous>, transform_indices = @transform_2, window_bounds = array<i64: 1, 96>}, {pipeline_mode = #tpu.pipeline_mode<synchronous>, transform_indices = @transform_3, window_bounds = array<i64: 32, 32>}, {pipeline_mode = #tpu.pipeline_mode<synchronous>, transform_indices = @transform_4, window_bounds = array<i64: 1, 32>}, {transform_indices = @transform_5, window_bounds = array<i64: 2, 8, 32>}]} {
    %c0 = arith.constant 0 : index
    %c0_0 = arith.constant 0 : index
    %c0_1 = arith.constant 0 : index
    %0 = vector.load %arg1[%c0, %c0_0, %c0_1] : memref<2x8x32xf32, #tpu.memory_space<vmem>>, vector<2x8x32xf32>
    %1 = vector.shape_cast %0 : vector<2x8x32xf32> to vector<16x32xf32>
    %2 = arith.truncf %1 : vector<16x32xf32> to vector<16x32xbf16>
    %c0_2 = arith.constant 0 : index
    %c0_3 = arith.constant 0 : index
    %3 = vector.load %arg2[%c0_2, %c0_3] : memref<32x96xbf16, #tpu.memory_space<vmem>>, vector<32x96xbf16>
    %cst = arith.constant dense<0.000000e+00> : vector<16x96xf32>
    %4 = tpu.matmul %2, %3, %cst {dimension_numbers = #tpu.dot_dimension_numbers<[1], [0], [0], [1], [0, 0, 1, 1], [], []>} : vector<16x32xbf16>, vector<32x96xbf16>, vector<16x96xf32> -> vector<16x96xf32>
    %c0_4 = arith.constant 0 : index
    %c0_5 = arith.constant 0 : index
    %5 = vector.load %arg3[%c0_4, %c0_5] : memref<1x96xf32, #tpu.memory_space<vmem>>, vector<1x96xf32>
    %6 = vector.shape_cast %5 : vector<1x96xf32> to vector<96xf32>
    %7 = vector.shape_cast %6 : vector<96xf32> to vector<1x96xf32>
    %8 = vector.broadcast %7 : vector<1x96xf32> to vector<16x96xf32>
    %9 = arith.addf %4, %8 : vector<16x96xf32>
    %10 = arith.truncf %9 : vector<16x96xf32> to vector<16x96xbf16>
    %11 = vector.shape_cast %10 : vector<16x96xbf16> to vector<2x8x96xbf16>
    %12 = tpu.iota {dimensions = array<i32: 1>} : vector<1x8x8xi32>
    %13 = tpu.iota {dimensions = array<i32: 2>} : vector<1x8x8xi32>
    %14 = arith.cmpi sle, %13, %12 : vector<1x8x8xi32>
    %15 = vector.extract_strided_slice %11 {offsets = [0, 0, 0], sizes = [2, 8, 8], strides = [1, 1, 1]} : vector<2x8x96xbf16> to vector<2x8x8xbf16>
    %16 = vector.extract_strided_slice %11 {offsets = [0, 0, 32], sizes = [2, 8, 8], strides = [1, 1, 1]} : vector<2x8x96xbf16> to vector<2x8x8xbf16>
    %17 = vector.extract_strided_slice %11 {offsets = [0, 0, 64], sizes = [2, 8, 8], strides = [1, 1, 1]} : vector<2x8x96xbf16> to vector<2x8x8xbf16>
    "tpu.trace_start"() <{level = 10 : i32, message = "bqd,bkd->bqk"}> : () -> ()
    %cst_6 = arith.constant dense<0.000000e+00> : vector<2x8x8xf32>
    %18 = tpu.matmul %15, %16, %cst_6 {dimension_numbers = #tpu.dot_dimension_numbers<[2], [2], [1], [1], [0, 0, 0, 1, 1, 1], [0], [0]>} : vector<2x8x8xbf16>, vector<2x8x8xbf16>, vector<2x8x8xf32> -> vector<2x8x8xf32>
    %cst_7 = arith.constant -1.000000e+30 : f32
    "tpu.trace_stop"() : () -> ()
    %19 = vector.shape_cast %14 : vector<1x8x8xi1> to vector<1x8x8xi1>
    %20 = vector.broadcast %19 : vector<1x8x8xi1> to vector<2x8x8xi1>
    %21 = vector.broadcast %cst_7 : f32 to vector<2x8x8xf32>
    %22 = arith.select %20, %18, %21 : vector<2x8x8xi1>, vector<2x8x8xf32>
    %cst_8 = arith.constant dense<0xFF800000> : vector<2x8xf32>
    %23 = vector.multi_reduction <maximumf>, %22, %cst_8 [2] : vector<2x8x8xf32> to vector<2x8xf32>
    %24 = vector.shape_cast %23 : vector<2x8xf32> to vector<2x8x1xf32>
    %25 = vector.broadcast %24 : vector<2x8x1xf32> to vector<2x8x8xf32>
    %26 = arith.subf %22, %25 : vector<2x8x8xf32>
    %27 = math.exp %26 : vector<2x8x8xf32>
    %cst_9 = arith.constant dense<0.000000e+00> : vector<2x8xf32>
    %28 = vector.multi_reduction <add>, %27, %cst_9 [2] : vector<2x8x8xf32> to vector<2x8xf32>
    %29 = vector.shape_cast %28 : vector<2x8xf32> to vector<2x8x1xf32>
    %30 = tpu.reciprocal %29 {approx = true} : vector<2x8x1xf32> -> vector<2x8x1xf32>
    %31 = vector.broadcast %30 : vector<2x8x1xf32> to vector<2x8x8xf32>
    %32 = arith.mulf %27, %31 : vector<2x8x8xf32>
    %33 = arith.truncf %32 : vector<2x8x8xf32> to vector<2x8x8xbf16>
    "tpu.trace_start"() <{level = 10 : i32, message = "bqk,bkd->bqd"}> : () -> ()
    %cst_10 = arith.constant dense<0.000000e+00> : vector<2x8x8xf32>
    %34 = tpu.matmul %33, %17, %cst_10 {dimension_numbers = #tpu.dot_dimension_numbers<[2], [1], [1], [2], [0, 0, 0, 1, 1, 2], [0], [0]>} : vector<2x8x8xbf16>, vector<2x8x8xbf16>, vector<2x8x8xf32> -> vector<2x8x8xf32>
    "tpu.trace_stop"() : () -> ()
    %c0_11 = arith.constant 0 : index
    %c0_12 = arith.constant 0 : index
    %c0_13 = arith.constant 0 : index
    %35 = vector.load %arg7[%c0_11, %c0_12, %c0_13] : memref<2x8x32xf32, #tpu.memory_space<vmem>>, vector<2x8x8xf32>
    tpu.vector_store %arg7[%c0_11, %c0_12, %c0_13], %34 {strides = array<i32>} : memref<2x8x32xf32, #tpu.memory_space<vmem>>, vector<2x8x8xf32>,
    %36 = vector.extract_strided_slice %11 {offsets = [0, 0, 8], sizes = [2, 8, 8], strides = [1, 1, 1]} : vector<2x8x96xbf16> to vector<2x8x8xbf16>
    %37 = vector.extract_strided_slice %11 {offsets = [0, 0, 40], sizes = [2, 8, 8], strides = [1, 1, 1]} : vector<2x8x96xbf16> to vector<2x8x8xbf16>
    %38 = vector.extract_strided_slice %11 {offsets = [0, 0, 72], sizes = [2, 8, 8], strides = [1, 1, 1]} : vector<2x8x96xbf16> to vector<2x8x8xbf16>
    "tpu.trace_start"() <{level = 10 : i32, message = "bqd,bkd->bqk"}> : () -> ()
    %cst_14 = arith.constant dense<0.000000e+00> : vector<2x8x8xf32>
    %39 = tpu.matmul %36, %37, %cst_14 {dimension_numbers = #tpu.dot_dimension_numbers<[2], [2], [1], [1], [0, 0, 0, 1, 1, 1], [0], [0]>} : vector<2x8x8xbf16>, vector<2x8x8xbf16>, vector<2x8x8xf32> -> vector<2x8x8xf32>
    %cst_15 = arith.constant -1.000000e+30 : f32
    "tpu.trace_stop"() : () -> ()
    %40 = vector.shape_cast %14 : vector<1x8x8xi1> to vector<1x8x8xi1>
    %41 = vector.broadcast %40 : vector<1x8x8xi1> to vector<2x8x8xi1>
    %42 = vector.broadcast %cst_15 : f32 to vector<2x8x8xf32>
    %43 = arith.select %41, %39, %42 : vector<2x8x8xi1>, vector<2x8x8xf32>
    %cst_16 = arith.constant dense<0xFF800000> : vector<2x8xf32>
    %44 = vector.multi_reduction <maximumf>, %43, %cst_16 [2] : vector<2x8x8xf32> to vector<2x8xf32>
    %45 = vector.shape_cast %44 : vector<2x8xf32> to vector<2x8x1xf32>
    %46 = vector.broadcast %45 : vector<2x8x1xf32> to vector<2x8x8xf32>
    %47 = arith.subf %43, %46 : vector<2x8x8xf32>
    %48 = math.exp %47 : vector<2x8x8xf32>
    %cst_17 = arith.constant dense<0.000000e+00> : vector<2x8xf32>
    %49 = vector.multi_reduction <add>, %48, %cst_17 [2] : vector<2x8x8xf32> to vector<2x8xf32>
    %50 = vector.shape_cast %49 : vector<2x8xf32> to vector<2x8x1xf32>
    %51 = tpu.reciprocal %50 {approx = true} : vector<2x8x1xf32> -> vector<2x8x1xf32>
    %52 = vector.broadcast %51 : vector<2x8x1xf32> to vector<2x8x8xf32>
    %53 = arith.mulf %48, %52 : vector<2x8x8xf32>
    %54 = arith.truncf %53 : vector<2x8x8xf32> to vector<2x8x8xbf16>
    "tpu.trace_start"() <{level = 10 : i32, message = "bqk,bkd->bqd"}> : () -> ()
    %cst_18 = arith.constant dense<0.000000e+00> : vector<2x8x8xf32>
    %55 = tpu.matmul %54, %38, %cst_18 {dimension_numbers = #tpu.dot_dimension_numbers<[2], [1], [1], [2], [0, 0, 0, 1, 1, 2], [0], [0]>} : vector<2x8x8xbf16>, vector<2x8x8xbf16>, vector<2x8x8xf32> -> vector<2x8x8xf32>
    "tpu.trace_stop"() : () -> ()
    %c0_19 = arith.constant 0 : index
    %c0_20 = arith.constant 0 : index
    %c8 = arith.constant 8 : index
    %56 = vector.load %arg7[%c0_19, %c0_20, %c8] : memref<2x8x32xf32, #tpu.memory_space<vmem>>, vector<2x8x8xf32>
    tpu.vector_store %arg7[%c0_19, %c0_20, %c8], %55 {strides = array<i32>} : memref<2x8x32xf32, #tpu.memory_space<vmem>>, vector<2x8x8xf32>,
    %57 = vector.extract_strided_slice %11 {offsets = [0, 0, 16], sizes = [2, 8, 8], strides = [1, 1, 1]} : vector<2x8x96xbf16> to vector<2x8x8xbf16>
    %58 = vector.extract_strided_slice %11 {offsets = [0, 0, 48], sizes = [2, 8, 8], strides = [1, 1, 1]} : vector<2x8x96xbf16> to vector<2x8x8xbf16>
    %59 = vector.extract_strided_slice %11 {offsets = [0, 0, 80], sizes = [2, 8, 8], strides = [1, 1, 1]} : vector<2x8x96xbf16> to vector<2x8x8xbf16>
    "tpu.trace_start"() <{level = 10 : i32, message = "bqd,bkd->bqk"}> : () -> ()
    %cst_21 = arith.constant dense<0.000000e+00> : vector<2x8x8xf32>
    %60 = tpu.matmul %57, %58, %cst_21 {dimension_numbers = #tpu.dot_dimension_numbers<[2], [2], [1], [1], [0, 0, 0, 1, 1, 1], [0], [0]>} : vector<2x8x8xbf16>, vector<2x8x8xbf16>, vector<2x8x8xf32> -> vector<2x8x8xf32>
    %cst_22 = arith.constant -1.000000e+30 : f32
    "tpu.trace_stop"() : () -> ()
    %61 = vector.shape_cast %14 : vector<1x8x8xi1> to vector<1x8x8xi1>
    %62 = vector.broadcast %61 : vector<1x8x8xi1> to vector<2x8x8xi1>
    %63 = vector.broadcast %cst_22 : f32 to vector<2x8x8xf32>
    %64 = arith.select %62, %60, %63 : vector<2x8x8xi1>, vector<2x8x8xf32>
    %cst_23 = arith.constant dense<0xFF800000> : vector<2x8xf32>
    %65 = vector.multi_reduction <maximumf>, %64, %cst_23 [2] : vector<2x8x8xf32> to vector<2x8xf32>
    %66 = vector.shape_cast %65 : vector<2x8xf32> to vector<2x8x1xf32>
    %67 = vector.broadcast %66 : vector<2x8x1xf32> to vector<2x8x8xf32>
    %68 = arith.subf %64, %67 : vector<2x8x8xf32>
    %69 = math.exp %68 : vector<2x8x8xf32>
    %cst_24 = arith.constant dense<0.000000e+00> : vector<2x8xf32>
    %70 = vector.multi_reduction <add>, %69, %cst_24 [2] : vector<2x8x8xf32> to vector<2x8xf32>
    %71 = vector.shape_cast %70 : vector<2x8xf32> to vector<2x8x1xf32>
    %72 = tpu.reciprocal %71 {approx = true} : vector<2x8x1xf32> -> vector<2x8x1xf32>
    %73 = vector.broadcast %72 : vector<2x8x1xf32> to vector<2x8x8xf32>
    %74 = arith.mulf %69, %73 : vector<2x8x8xf32>
    %75 = arith.truncf %74 : vector<2x8x8xf32> to vector<2x8x8xbf16>
    "tpu.trace_start"() <{level = 10 : i32, message = "bqk,bkd->bqd"}> : () -> ()
    %cst_25 = arith.constant dense<0.000000e+00> : vector<2x8x8xf32>
    %76 = tpu.matmul %75, %59, %cst_25 {dimension_numbers = #tpu.dot_dimension_numbers<[2], [1], [1], [2], [0, 0, 0, 1, 1, 2], [0], [0]>} : vector<2x8x8xbf16>, vector<2x8x8xbf16>, vector<2x8x8xf32> -> vector<2x8x8xf32>
    "tpu.trace_stop"() : () -> ()
    %c0_26 = arith.constant 0 : index
    %c0_27 = arith.constant 0 : index
    %c16 = arith.constant 16 : index
    %77 = vector.load %arg7[%c0_26, %c0_27, %c16] : memref<2x8x32xf32, #tpu.memory_space<vmem>>, vector<2x8x8xf32>
    tpu.vector_store %arg7[%c0_26, %c0_27, %c16], %76 {strides = array<i32>} : memref<2x8x32xf32, #tpu.memory_space<vmem>>, vector<2x8x8xf32>,
    %78 = vector.extract_strided_slice %11 {offsets = [0, 0, 24], sizes = [2, 8, 8], strides = [1, 1, 1]} : vector<2x8x96xbf16> to vector<2x8x8xbf16>
    %79 = vector.extract_strided_slice %11 {offsets = [0, 0, 56], sizes = [2, 8, 8], strides = [1, 1, 1]} : vector<2x8x96xbf16> to vector<2x8x8xbf16>
    %80 = vector.extract_strided_slice %11 {offsets = [0, 0, 88], sizes = [2, 8, 8], strides = [1, 1, 1]} : vector<2x8x96xbf16> to vector<2x8x8xbf16>
    "tpu.trace_start"() <{level = 10 : i32, message = "bqd,bkd->bqk"}> : () -> ()
    %cst_28 = arith.constant dense<0.000000e+00> : vector<2x8x8xf32>
    %81 = tpu.matmul %78, %79, %cst_28 {dimension_numbers = #tpu.dot_dimension_numbers<[2], [2], [1], [1], [0, 0, 0, 1, 1, 1], [0], [0]>} : vector<2x8x8xbf16>, vector<2x8x8xbf16>, vector<2x8x8xf32> -> vector<2x8x8xf32>
    %cst_29 = arith.constant -1.000000e+30 : f32
    "tpu.trace_stop"() : () -> ()
    %82 = vector.shape_cast %14 : vector<1x8x8xi1> to vector<1x8x8xi1>
    %83 = vector.broadcast %82 : vector<1x8x8xi1> to vector<2x8x8xi1>
    %84 = vector.broadcast %cst_29 : f32 to vector<2x8x8xf32>
    %85 = arith.select %83, %81, %84 : vector<2x8x8xi1>, vector<2x8x8xf32>
    %cst_30 = arith.constant dense<0xFF800000> : vector<2x8xf32>
    %86 = vector.multi_reduction <maximumf>, %85, %cst_30 [2] : vector<2x8x8xf32> to vector<2x8xf32>
    %87 = vector.shape_cast %86 : vector<2x8xf32> to vector<2x8x1xf32>
    %88 = vector.broadcast %87 : vector<2x8x1xf32> to vector<2x8x8xf32>
    %89 = arith.subf %85, %88 : vector<2x8x8xf32>
    %90 = math.exp %89 : vector<2x8x8xf32>
    %cst_31 = arith.constant dense<0.000000e+00> : vector<2x8xf32>
    %91 = vector.multi_reduction <add>, %90, %cst_31 [2] : vector<2x8x8xf32> to vector<2x8xf32>
    %92 = vector.shape_cast %91 : vector<2x8xf32> to vector<2x8x1xf32>
    %93 = tpu.reciprocal %92 {approx = true} : vector<2x8x1xf32> -> vector<2x8x1xf32>
    %94 = vector.broadcast %93 : vector<2x8x1xf32> to vector<2x8x8xf32>
    %95 = arith.mulf %90, %94 : vector<2x8x8xf32>
    %96 = arith.truncf %95 : vector<2x8x8xf32> to vector<2x8x8xbf16>
    "tpu.trace_start"() <{level = 10 : i32, message = "bqk,bkd->bqd"}> : () -> ()
    %cst_32 = arith.constant dense<0.000000e+00> : vector<2x8x8xf32>
    %97 = tpu.matmul %96, %80, %cst_32 {dimension_numbers = #tpu.dot_dimension_numbers<[2], [1], [1], [2], [0, 0, 0, 1, 1, 2], [0], [0]>} : vector<2x8x8xbf16>, vector<2x8x8xbf16>, vector<2x8x8xf32> -> vector<2x8x8xf32>
    "tpu.trace_stop"() : () -> ()
    %c0_33 = arith.constant 0 : index
    %c0_34 = arith.constant 0 : index
    %c24 = arith.constant 24 : index
    %98 = vector.load %arg7[%c0_33, %c0_34, %c24] : memref<2x8x32xf32, #tpu.memory_space<vmem>>, vector<2x8x8xf32>
    tpu.vector_store %arg7[%c0_33, %c0_34, %c24], %97 {strides = array<i32>} : memref<2x8x32xf32, #tpu.memory_space<vmem>>, vector<2x8x8xf32>,
    %c0_35 = arith.constant 0 : index
    %c0_36 = arith.constant 0 : index
    %c0_37 = arith.constant 0 : index
    %99 = vector.load %arg7[%c0_35, %c0_36, %c0_37] : memref<2x8x32xf32, #tpu.memory_space<vmem>>, vector<2x8x32xf32>
    %100 = vector.shape_cast %99 : vector<2x8x32xf32> to vector<16x32xf32>
    %101 = arith.truncf %100 : vector<16x32xf32> to vector<16x32xbf16>
    %c0_38 = arith.constant 0 : index
    %c0_39 = arith.constant 0 : index
    %102 = vector.load %arg4[%c0_38, %c0_39] : memref<32x32xbf16, #tpu.memory_space<vmem>>, vector<32x32xbf16>
    %cst_40 = arith.constant dense<0.000000e+00> : vector<16x32xf32>
    %103 = tpu.matmul %101, %102, %cst_40 {dimension_numbers = #tpu.dot_dimension_numbers<[1], [0], [0], [1], [0, 0, 1, 1], [], []>} : vector<16x32xbf16>, vector<32x32xbf16>, vector<16x32xf32> -> vector<16x32xf32>
    %c0_41 = arith.constant 0 : index
    %c0_42 = arith.constant 0 : index
    %104 = vector.load %arg5[%c0_41, %c0_42] : memref<1x32xf32, #tpu.memory_space<vmem>>, vector<1x32xf32>
    %105 = vector.shape_cast %104 : vector<1x32xf32> to vector<32xf32>
    %106 = vector.shape_cast %105 : vector<32xf32> to vector<1x32xf32>
    %107 = vector.broadcast %106 : vector<1x32xf32> to vector<16x32xf32>
    %108 = arith.addf %103, %107 : vector<16x32xf32>
    %109 = vector.shape_cast %108 : vector<16x32xf32> to vector<2x8x32xf32>
    %c0_43 = arith.constant 0 : index
    %c0_44 = arith.constant 0 : index
    %c0_45 = arith.constant 0 : index
    %110 = vector.load %arg6[%c0_43, %c0_44, %c0_45] : memref<2x8x32xf32, #tpu.memory_space<vmem>>, vector<2x8x32xf32>
    tpu.vector_store %arg6[%c0_43, %c0_44, %c0_45], %109 {strides = array<i32>} : memref<2x8x32xf32, #tpu.memory_space<vmem>>, vector<2x8x32xf32>,
    return
  }
  func.func @transform_0(%arg0: i32) -> (i32, i32, i32) {
    %c0_i32 = arith.constant 0 : i32
    %c0_i32_0 = arith.constant 0 : i32
    %c0_i32_1 = arith.constant 0 : i32
    return %arg0, %c0_i32, %c0_i32_0 : i32, i32, i32
  }
  func.func @transform_1(%arg0: i32) -> (i32, i32) {
    %c0_i32 = arith.constant 0 : i32
    %c0_i32_0 = arith.constant 0 : i32
    %c0_i32_1 = arith.constant 0 : i32
    return %c0_i32, %c0_i32_0 : i32, i32
  }
  func.func @transform_2(%arg0: i32) -> (i32, i32) {
    %c0_i32 = arith.constant 0 : i32
    %c0_i32_0 = arith.constant 0 : i32
    %c0_i32_1 = arith.constant 0 : i32
    return %c0_i32, %c0_i32_0 : i32, i32
  }
  func.func @transform_3(%arg0: i32) -> (i32, i32) {
    %c0_i32 = arith.constant 0 : i32
    %c0_i32_0 = arith.constant 0 : i32
    %c0_i32_1 = arith.constant 0 : i32
    return %c0_i32, %c0_i32_0 : i32, i32
  }
  func.func @transform_4(%arg0: i32) -> (i32, i32) {
    %c0_i32 = arith.constant 0 : i32
    %c0_i32_0 = arith.constant 0 : i32
    %c0_i32_1 = arith.constant 0 : i32
    return %c0_i32, %c0_i32_0 : i32, i32
  }
  func.func @transform_5(%arg0: i32) -> (i32, i32, i32) {
    %c0_i32 = arith.constant 0 : i32
    %c0_i32_0 = arith.constant 0 : i32
    %c0_i32_1 = arith.constant 0 : i32
    return %arg0, %c0_i32, %c0_i32_0 : i32, i32, i32
  }
}

</mosaic_0001>

<bundles_post_ra>
// kernel: tpu_custom_call.1
= control target key start
LH: loop header
LB: loop body
LE: loop exit
PB: predicated region body
PF: predicated region fallthrough
CT: control target
= control target key end

     0   :  { %10 = vsyncpa [#allocation4], 0  ;;  %s1076_s0 = inlined_call_operand.hbm [shape: f32[2,8,32], index: 0, kind: input, shape index: {}]   ;;  %s1077_s1 = inlined_call_operand.hbm [shape: bf16[32,96], index: 1, kind: input, shape index: {}]   ;;  %s1078_s2 = inlined_call_operand.vmem [shape: f32[1,96], index: 2, kind: input, shape index: {}]   ;;  %s1079_s3 = inlined_call_operand.hbm [shape: bf16[32,32], index: 3, kind: input, shape index: {}]   ;;  %s1080_s4 = inlined_call_operand.vmem [shape: f32[1,32], index: 4, kind: input, shape index: {}]   ;;  %s1081_s5 = inlined_call_operand.hbm [shape: f32[2,8,32], index: 5, kind: output, shape index: {}]  }
   0x1   :  { %11 = vsyncpa [#allocation7], 0  ;;  %s30_s20 = sshll.u32 %s1077_s1, 4  ;;  %s31_s20 = int_to_ptr.hbm [resolvable:$true] %s30_s20 }
   0x2   :  { %12 = vsyncpa [#allocation5], 0  ;;  %s870_s21 = smov [#allocation6]   ;;  %s17_s25 = sshll.u32 %s1076_s0, 4  ;;  %s18_s25 = int_to_ptr.hbm [resolvable:$true] %s17_s25 }
   0x3   :  { %s32_s22 = sshll.u32 %s870_s21, 4  ;;  %s871_s26 = smov 64   ;;  %s33_s22 = int_to_ptr.vmem [resolvable:$true] %s32_s22 }
   0x4   :  { %s872_s27 = smov 4   ;;  %s873_s28 = smov [#allocation3]  }
   0x5   :  { %38 = dma.hbm_to_vmem [thread:$0]  %s31_s20, 256, %s33_s22, [#allocation7], %s871_s26, %s871_s26, %s872_s27  }
   0x6   :  { %s19_s29 = sshll.u32 %s873_s28, 4  ;;  %s874_s30 = smov 128   ;;  %s20_s29 = int_to_ptr.vmem [resolvable:$true] %s19_s29 }
   0x7   :  { %s875_s1 = smov 8   ;;  %s45_s8 = sshll.u32 %s1079_s3, 4  ;;  %s46_s8 = int_to_ptr.hbm [resolvable:$true] %s45_s8 }
   0x8   :  { %25 = dma.hbm_to_vmem [thread:$0]  %s18_s25, 256, %s20_s29, [#allocation4], %s874_s30, %s874_s30, %s875_s1  }
   0x9   :  { %s876_s0 = smov [#allocation8]  }
   0xa   :  { %s47_s9 = sshll.u32 %s876_s0, 4  ;;  %s48_s9 = int_to_ptr.vmem [resolvable:$true] %s47_s9 }
   0xb   :  { %53 = dma.hbm_to_vmem [thread:$0]  %s46_s8, 256, %s48_s9, [#allocation7], %s871_s26, %s871_s26, %s872_s27  }
   0xc   :  { %864 = dma.done.wait [#allocation4], 256  }
   0xd   :  { %865 = vsyncadd [#allocation4], 4294967040 }
   0xe   :  { %866 = dma.done.wait [#allocation7], 512  }
   0xf   :  { %867 = vsyncadd [#allocation7], 4294966784  ;;  %v711_v0 = vld [vmem:[#allocation6 + $0x8] sm:$0xff]  ;;  %v710_v1 = vld [vmem:[#allocation6] sm:$0xff]  ;;  %vm92_vm0 = vcmask 261120   ;;  %s877_s11 = smov 120   ;;  %v112_v38 = vlaneseq }
  0x10   :  { %102 = vmatpush.bf16.msra.mxu0 %v711_v0  ;;  %v69_v2 = vld [vmem:[#allocation3] sm:$0xff]  ;;  %v70_v3 = vld [vmem:[#allocation3 + $0x8] sm:$0xff]  ;;  %v734_v5 = vld [vmem:[%s1078_s2] ss:$0 sm:$0xff]  ;;  %s878_s12 = smov 88   ;;  %s879_s13 = smov 96  }
  0x11   :  { %v71_v4 = vpack.c.bf16 %v70_v3, %v69_v2  ;;  %s880_s2 = smov 112   ;;  %s881_s14 = smov 80   ;;  %vm122_vm1 = vcmask 64512   ;;  %v113_v39 = vshrl.u32 %v112_v38, 7  ;;  %v115_v40 = vand.u32 127, %v112_v38 }
  0x12   :  { %s882_s15 = smov 72   ;;  %s883_s16 = smov 104   ;;  %vm199_vm3 = vcmask 1043456   ;;  %vm361_vm4 = vcmask 130112   ;;  %vm486_vm5 = vcmask 195712   ;;  %vm611_vm6 = vcmask 261312  }
  0x13   :  { %vm974_vm2 = vcmp.le.s32.totalorder %v115_v40, %v113_v39  ;;  %s884_s17 = smov 56   ;;  %s885_s18 = smov 48  }
  0x14   :  { %103 = vmatpush.bf16.msra.mxu0 %v710_v1  ;;  %s886_s19 = smov 40   ;;  %s887_s20 = smov 16  }
  0x15   :  { %s888_s21 = smov 24   ;;  %s889_s24 = smov [#allocation9]  }
  0x16   :  { %s660_s25 = sshll.u32 %s889_s24, 4  ;;  %s662_s28 = sshll.u32 %s1081_s5, 4  ;;  %s661_s25 = int_to_ptr.vmem [resolvable:$true] %s660_s25  ;;  %s663_s28 = int_to_ptr.hbm [resolvable:$true] %s662_s28 }
  0x17   :  { %684 = vmatmul.msk.bf16.vlgmr.msra.gmra.mxu0 %vm92_vm0, %v71_v4 }
  0x94   :  { %v105_v6 = vpop.f32.mrf.mxu0 }
  0x95   :  { %v106_v7 = vadd.f32 %v734_v5, %v105_v6 }
  0x97   :  { %v110_v8 = vpack.c.bf16 %v106_v7, %v106_v7 }
  0x99   :  { %v118_v9 = vunpack.c.l.b16 %v110_v8 }
  0x9b   :  { %v940_v10 = vpack.c.b16 %v118_v9, %v118_v9 }
  0x9c   :  { %v107_v11 = vpop.f32.mrf.mxu0 }
  0x9d   :  { %v108_v12 = vadd.f32 %v734_v5, %v107_v11  ;;  %239 = vrot.lane.b32.xlu2 %v940_v10, %s877_s11  ;;  %241 = vrot.lane.b32.xlu1 %v940_v10, %s878_s12 }
  0x9e   :  { %120 = vrot.lane.b32.xlu0 %v940_v10, %s879_s13 }
  0x9f   :  { %v111_v13 = vpack.c.bf16 %v108_v12, %v108_v12 }
  0xa1   :  { %v143_v14 = vunpack.c.l.b16 %v111_v13 }
  0xa3   :  { %v945_v15 = vpack.c.b16 %v143_v14, %v143_v14 }
  0xa5   :  { %262 = vrot.lane.b32.xlu2 %v945_v15, %s877_s11  ;;  %264 = vrot.lane.b32.xlu1 %v945_v15, %s878_s12 }
  0xa6   :  { %145 = vrot.lane.b32.xlu0 %v945_v15, %s879_s13 }
  0xad   :  { %364 = vrot.lane.b32.xlu2 %v940_v10, %s880_s2  ;;  %389 = vrot.lane.b32.xlu1 %v945_v15, %s881_s14 }
  0xae   :  { %366 = vrot.lane.b32.xlu0 %v940_v10, %s881_s14 }
  0xb5   :  { %514 = vrot.lane.b32.xlu2 %v945_v15, %s882_s15  ;;  %491 = vrot.lane.b32.xlu1 %v940_v10, %s882_s15 }
  0xb6   :  { %387 = vrot.lane.b32.xlu0 %v945_v15, %s880_s2 }
  0xbd   :  { %512 = vrot.lane.b32.xlu1 %v945_v15, %s883_s16 }
  0xbe   :  { %489 = vrot.lane.b32.xlu0 %v940_v10, %s883_s16 }
  0xf7   :  { %v240_v16 = vpop.permute.xlu2 %239 }
  0xff   :  { %v263_v21 = vpop.permute.xlu2 %262 }
 0x107   :  { %v365_v26 = vpop.permute.xlu2 %364 }
 0x10f   :  { %v242_v17 = vpop.permute.xlu1 %241  ;;  %v515_v31 = vpop.permute.xlu2 %514 }
 0x110   :  { %v121_v18 = vpop.permute.xlu0 %120  ;;  %v247_v19 = vsel %vm122_vm1, %v242_v17, 0  ;;  %v520_v34 = vsel %vm122_vm1, %v515_v31, 0 }
 0x111   :  { %v127_v20 = vsel %vm122_vm1, %v121_v18, 0  ;;  %256 = vmatpush.bf16.xpose.msrb.mxu0 %v247_v19 }
 0x112   :  { %136 = vmatpush.bf16.xpose.msra.mxu1 %v127_v20 }
 0x117   :  { %v265_v22 = vpop.permute.xlu1 %264 }
 0x118   :  { %v146_v23 = vpop.permute.xlu0 %145  ;;  %689 = vmatmul.msk.bf16.vlgmr.msrb.gmra.mxu0 %vm122_vm1, %v240_v16  ;;  %v270_v24 = vsel %vm122_vm1, %v265_v22, 0 }
 0x119   :  { %685 = vmatmul.msk.bf16.vlgmr.msra.gmra.mxu1 %vm122_vm1, %v110_v8  ;;  %v151_v25 = vsel %vm122_vm1, %v146_v23, 0 }
 0x11a   :  { %160 = vmatpush.bf16.xpose.msra.mxu2 %v151_v25  ;;  %279 = vmatpush.bf16.xpose.msrb.mxu1 %v270_v24 }
 0x11f   :  { %v390_v27 = vpop.permute.xlu1 %389 }
 0x120   :  { %v395_v28 = vsel %vm122_vm1, %v390_v27, 0  ;;  %v367_v29 = vpop.permute.xlu0 %366 }
 0x121   :  { %v372_v30 = vsel %vm122_vm1, %v367_v29, 0  ;;  %686 = vmatmul.msk.bf16.vlgmr.msra.gmra.mxu2 %vm122_vm1, %v111_v13 }
 0x122   :  { %404 = vmatpush.bf16.xpose.msra.mxu1 %v395_v28  ;;  %381 = vmatpush.bf16.xpose.msra.mxu0 %v372_v30 }
 0x127   :  { %v492_v32 = vpop.permute.xlu1 %491 }
 0x128   :  { %v497_v33 = vsel %vm122_vm1, %v492_v32, 0  ;;  %v388_v35 = vpop.permute.xlu0 %387 }
 0x129   :  { %690 = vmatmul.msk.bf16.vlgmr.msrb.gmra.mxu1 %vm122_vm1, %v263_v21  ;;  %693 = vmatmul.msk.bf16.vlgmr.msra.gmra.mxu0 %vm122_vm1, %v365_v26 }
 0x12a   :  { %529 = vmatpush.bf16.xpose.msrb.mxu1 %v520_v34  ;;  %506 = vmatpush.bf16.xpose.msrb.mxu0 %v497_v33 }
 0x12f   :  { %v513_v37 = vpop.permute.xlu1 %512 }
 0x130   :  { %v490_v36 = vpop.permute.xlu0 %489 }
 0x139   :  { %694 = vmatmul.msk.bf16.vlgmr.msra.gmra.mxu1 %vm122_vm1, %v388_v35  ;;  %697 = vmatmul.msk.bf16.vlgmr.msrb.gmra.mxu0 %vm122_vm1, %v490_v36 }
 0x149   :  { %698 = vmatmul.msk.bf16.vlgmr.msrb.gmra.mxu1 %vm122_vm1, %v513_v37 }
 0x195   :  { %v258_v42 = vpop.f32.mrf.mxu0 }
 0x196   :  { %v138_v43 = vpop.f32.mrf.mxu1  ;;  %v285_v44 = vsel %vm974_vm2, %v258_v42, -1e+30 }
 0x197   :  { %v168_v45 = vsel %vm974_vm2, %v138_v43, -1e+30  ;;  %v287_v46 = vsel %vm122_vm1, %v285_v44, -inf }
 0x198   :  { %288 = vmax.xlane.f32.xlu1 %v287_v46  ;;  %v170_v47 = vsel %vm122_vm1, %v168_v45, -inf }
 0x199   :  { %171 = vmax.xlane.f32.xlu2 %v170_v47 }
 0x19d   :  { %v260_v48 = vpop.f32.mrf.mxu0 }
 0x19e   :  { %v140_v49 = vpop.f32.mrf.mxu1 }
 0x1a4   :  { %v162_v50 = vpop.f32.mrf.mxu2 }
 0x1a5   :  { %v169_v51 = vsel %vm974_vm2, %v162_v50, -1e+30 }
 0x1a6   :  { %v281_v52 = vpop.f32.mrf.mxu1  ;;  %v383_v53 = vpop.f32.mrf.mxu0  ;;  %v173_v54 = vsel %vm122_vm1, %v169_v51, -inf }
 0x1a7   :  { %v286_v55 = vsel %vm974_vm2, %v281_v52, -1e+30  ;;  %v991_v56 = vsel %vm974_vm2, %v383_v53, -1e+30  ;;  %174 = vmax.xlane.f32.xlu0 %v173_v54 }
 0x1a8   :  { %v290_v57 = vsel %vm122_vm1, %v286_v55, -inf  ;;  %v412_v8 = vsel %vm122_vm1, %v991_v56, -inf }
 0x1a9   :  { %291 = vmax.xlane.f32.xlu2 %v290_v57 }
 0x1ac   :  { %v164_v58 = vpop.f32.mrf.mxu2 }
 0x1ae   :  { %v283_v59 = vpop.f32.mrf.mxu1  ;;  %v385_v60 = vpop.f32.mrf.mxu0 }
 0x1b1   :  { %216 = vrot.lane.b32.xlu1 %v945_v15, %s871_s26 }
 0x1b6   :  { %v406_v61 = vpop.f32.mrf.mxu1  ;;  %v508_v62 = vpop.f32.mrf.mxu0 }
 0x1b7   :  { %v411_v4 = vsel %vm974_vm2, %v406_v61, -1e+30  ;;  %v535_v7 = vsel %vm974_vm2, %v508_v62, -1e+30 }
 0x1b8   :  { %v415_v6 = vsel %vm122_vm1, %v411_v4, -inf  ;;  %v537_v9 = vsel %vm122_vm1, %v535_v7, -inf }
 0x1b9   :  { %332 = vrot.lane.b32.xlu1 %v945_v15, %s884_s17 }
 0x1bb   :  { %311 = vrot.lane.b32.xlu0 %v940_v10, %s884_s17 }
 0x1be   :  { %v408_v63 = vpop.f32.mrf.mxu1  ;;  %v510_v0 = vpop.f32.mrf.mxu0 }
 0x1c1   :  { %194 = vrot.lane.b32.xlu2 %v940_v10, %s871_s26 }
 0x1c6   :  { %v531_v1 = vpop.f32.mrf.mxu1 }
 0x1c7   :  { %v536_v3 = vsel %vm974_vm2, %v531_v1, -1e+30 }
 0x1c8   :  { %v540_v5 = vsel %vm122_vm1, %v536_v3, -inf }
 0x1ce   :  { %v533_v2 = vpop.f32.mrf.mxu1 }
 0x1e3   :  { %541 = vmax.xlane.f32.xlu1 %v540_v5 }
 0x1e5   :  { %416 = vmax.xlane.f32.xlu0 %v415_v6 }
 0x1ea   :  { %413 = vmax.xlane.f32.xlu2 %v412_v8 }
 0x1ed   :  { %538 = vmax.xlane.f32.xlu0 %v537_v9 }
 0x20b   :  { %v289_v11 = vpop.xlane.xlu1 %288 }
 0x20c   :  { %v293_v12 = vsub.f32 %v285_v44, %v289_v11  ;;  %v172_v13 = vpop.xlane.xlu2 %171 }
 0x20d   :  { %v176_v14 = vsub.f32 %v168_v45, %v172_v13 }
 0x20e   :  { %v295_v16 = vmul.f32 1.442695, %v293_v12 }
 0x20f   :  { %v178_v17 = vmul.f32 1.442695, %v176_v14 }
 0x210   :  { %736 = vpow2.f32 %v295_v16 }
 0x211   :  { %738 = vpow2.f32 %v178_v17 }
 0x216   :  { %v1011_v18 = vpop.eup %736 }
 0x217   :  { %v1013_v19 = vpop.eup %738  ;;  %v299_v20 = vsel %vm122_vm1, %v1011_v18, 0.0 }
 0x218   :  { %v182_v21 = vsel %vm122_vm1, %v1013_v19, 0.0  ;;  %300 = vadd.xlane.f32.xlu0 %v299_v20 }
 0x219   :  { %183 = vadd.xlane.f32.xlu1 %v182_v21 }
 0x21a   :  { %v175_v22 = vpop.xlane.xlu0 %174 }
 0x21b   :  { %v177_v23 = vsub.f32 %v169_v51, %v175_v22 }
 0x21c   :  { %v292_v24 = vpop.xlane.xlu2 %291 }
 0x21d   :  { %v180_v25 = vmul.f32 1.442695, %v177_v23  ;;  %v294_v26 = vsub.f32 %v286_v55, %v292_v24 }
 0x21f   :  { %740 = vpow2.f32 %v180_v25  ;;  %v297_v27 = vmul.f32 1.442695, %v294_v26 }
 0x221   :  { %742 = vpow2.f32 %v297_v27 }
 0x223   :  { %v217_v28 = vpop.permute.xlu1 %216 }
 0x224   :  { %v195_v29 = vpop.permute.xlu2 %194  ;;  %v222_v30 = vsel %vm199_vm3, %v217_v28, 0 }
 0x225   :  { %v1020_v31 = vpop.eup %740  ;;  %v201_v32 = vsel %vm199_vm3, %v195_v29, 0 }
 0x226   :  { %210 = vmatpush.bf16.msra.mxu3 %v201_v32  ;;  %v185_v33 = vsel %vm122_vm1, %v1020_v31, 0.0 }
 0x227   :  { %v1025_v34 = vpop.eup %742  ;;  %186 = vadd.xlane.f32.xlu0 %v185_v33 }
 0x228   :  { %v302_v35 = vsel %vm122_vm1, %v1025_v34, 0.0 }
 0x229   :  { %303 = vadd.xlane.f32.xlu2 %v302_v35 }
 0x22a   :  { %231 = vmatpush.bf16.msrb.mxu3 %v222_v30 }
 0x22b   :  { %v333_v38 = vpop.permute.xlu1 %332 }
 0x22d   :  { %v312_v36 = vpop.permute.xlu0 %311 }
 0x22e   :  { %v317_v37 = vsel %vm199_vm3, %v312_v36, 0 }
 0x22f   :  { %326 = vmatpush.bf16.msrb.mxu2 %v317_v37 }
 0x232   :  { %457 = vrot.lane.b32.xlu1 %v945_v15, %s885_s18 }
 0x241   :  { %436 = vrot.lane.b32.xlu2 %v940_v10, %s885_s18 }
 0x256   :  { %v542_v39 = vpop.xlane.xlu1 %541 }
 0x257   :  { %v544_v40 = vsub.f32 %v536_v3, %v542_v39  ;;  %v338_v3 = vsel %vm199_vm3, %v333_v38, 0 }
 0x258   :  { %v417_v41 = vpop.xlane.xlu0 %416 }
 0x259   :  { %v419_v42 = vsub.f32 %v411_v4, %v417_v41  ;;  %v547_v44 = vmul.f32 1.442695, %v544_v40 }
 0x25b   :  { %v422_v43 = vmul.f32 1.442695, %v419_v42 }
 0x25d   :  { %744 = vpow2.f32 %v422_v43  ;;  %v414_v45 = vpop.xlane.xlu2 %413 }
 0x25e   :  { %v418_v46 = vsub.f32 %v991_v56, %v414_v45  ;;  %746 = vpow2.f32 %v547_v44 }
 0x260   :  { %v420_v47 = vmul.f32 1.442695, %v418_v46  ;;  %v539_v48 = vpop.xlane.xlu0 %538 }
 0x261   :  { %v543_v49 = vsub.f32 %v535_v7, %v539_v48 }
 0x262   :  { %748 = vpow2.f32 %v420_v47 }
 0x263   :  { %v745_v50 = vpop.eup %744  ;;  %v545_v51 = vmul.f32 1.442695, %v543_v49 }
 0x264   :  { %v427_v52 = vsel %vm122_vm1, %v745_v50, 0.0  ;;  %v1034_v53 = vpop.eup %746 }
 0x265   :  { %750 = vpow2.f32 %v545_v51  ;;  %428 = vadd.xlane.f32.xlu0 %v427_v52  ;;  %v552_v57 = vsel %vm122_vm1, %v1034_v53, 0.0 }
 0x268   :  { %v749_v54 = vpop.eup %748 }
 0x269   :  { %v424_v55 = vsel %vm122_vm1, %v749_v54, 0.0 }
 0x26a   :  { %425 = vadd.xlane.f32.xlu1 %v424_v55  ;;  %553 = vadd.xlane.f32.xlu2 %v552_v57  ;;  %v712_v55 = vld [vmem:[#allocation8] sm:$0xff] }
 0x26b   :  { %v751_v56 = vpop.eup %750 }
 0x26c   :  { %v549_v58 = vsel %vm122_vm1, %v751_v56, 0.0 }
 0x26d   :  { %550 = vadd.xlane.f32.xlu0 %v549_v58 }
 0x281   :  { %561 = vrot.lane.b32.xlu0 %v940_v10, %s886_s19 }
 0x283   :  { %582 = vrot.lane.b32.xlu1 %v945_v15, %s886_s19 }
 0x28b   :  { %v301_v59 = vpop.xlane.xlu0 %300 }
 0x28c   :  { %v184_v60 = vpop.xlane.xlu1 %183  ;;  %752 = vrcp.f32 %v301_v59 }
 0x28d   :  { %754 = vrcp.f32 %v184_v60 }
 0x292   :  { %v753_v61 = vpop.eup %752 }
 0x293   :  { %v755_v62 = vpop.eup %754  ;;  %v307_v63 = vmul.f32 %v753_v61, %v1011_v18 }
 0x294   :  { %v190_v0 = vmul.f32 %v755_v62, %v1013_v19 }
 0x295   :  { %v309_v1 = vpack.c.bf16 %v307_v63, %v307_v63  ;;  %v735_v63 = vld [vmem:[%s1080_s4] ss:$0 sm:$0xff] }
 0x296   :  { %v192_v2 = vpack.c.bf16 %v190_v0, %v190_v0 }
 0x297   :  { %691 = vmatmul.msk.bf16.vlgmr.msrb.gmra.mxu2 %vm122_vm1, %v309_v1 }
 0x298   :  { %687 = vmatmul.msk.bf16.vlgmr.msra.gmra.mxu3 %vm122_vm1, %v192_v2 }
 0x299   :  { %347 = vmatpush.bf16.msra.mxu3 %v338_v3 }
 0x29a   :  { %v187_v10 = vpop.xlane.xlu0 %186 }
 0x29b   :  { %756 = vrcp.f32 %v187_v10 }
 0x29c   :  { %v304_v15 = vpop.xlane.xlu2 %303 }
 0x29d   :  { %758 = vrcp.f32 %v304_v15 }
 0x2a1   :  { %v757_v4 = vpop.eup %756 }
 0x2a2   :  { %v191_v5 = vmul.f32 %v757_v4, %v1020_v31 }
 0x2a3   :  { %v759_v12 = vpop.eup %758 }
 0x2a4   :  { %v437_v6 = vpop.permute.xlu2 %436  ;;  %v458_v8 = vpop.permute.xlu1 %457  ;;  %v193_v9 = vpack.c.bf16 %v191_v5, %v191_v5  ;;  %v308_v13 = vmul.f32 %v759_v12, %v1025_v34 }
 0x2a5   :  { %v442_v7 = vsel %vm199_vm3, %v437_v6, 0  ;;  %v463_v11 = vsel %vm199_vm3, %v458_v8, 0 }
 0x2a6   :  { %451 = vmatpush.bf16.msra.mxu2 %v442_v7  ;;  %v310_v14 = vpack.c.bf16 %v308_v13, %v308_v13 }
 0x2a8   :  { %688 = vmatmul.msk.bf16.vlgmr.msrb.gmra.mxu3 %vm122_vm1, %v193_v9 }
 0x2a9   :  { %472 = vmatpush.bf16.msrb.mxu3 %v463_v11 }
 0x2b8   :  { %692 = vmatmul.msk.bf16.vlgmr.msra.gmra.mxu3 %vm122_vm1, %v310_v14 }
 0x2d8   :  { %v429_v16 = vpop.xlane.xlu0 %428 }
 0x2d9   :  { %760 = vrcp.f32 %v429_v16 }
 0x2dd   :  { %v426_v17 = vpop.xlane.xlu1 %425  ;;  %v554_v23 = vpop.xlane.xlu2 %553 }
 0x2de   :  { %762 = vrcp.f32 %v426_v17 }
 0x2df   :  { %v761_v18 = vpop.eup %760  ;;  %764 = vrcp.f32 %v554_v23 }
 0x2e0   :  { %v433_v19 = vmul.f32 %v761_v18, %v745_v50  ;;  %v551_v25 = vpop.xlane.xlu0 %550 }
 0x2e1   :  { %766 = vrcp.f32 %v551_v25 }
 0x2e2   :  { %v435_v20 = vpack.c.bf16 %v433_v19, %v433_v19 }
 0x2e4   :  { %696 = vmatmul.msk.bf16.vlgmr.msrb.gmra.mxu3 %vm122_vm1, %v435_v20  ;;  %v763_v21 = vpop.eup %762 }
 0x2e5   :  { %v432_v22 = vmul.f32 %v763_v21, %v749_v54  ;;  %v765_v26 = vpop.eup %764  ;;  %v713_v54 = vld [vmem:[#allocation8 + $0x8] sm:$0xff] }
 0x2e6   :  { %v558_v29 = vmul.f32 %v765_v26, %v1034_v53  ;;  %646 = vmatpush.bf16.msra.mxu0 %v713_v54 }
 0x2e7   :  { %v434_v24 = vpack.c.bf16 %v432_v22, %v432_v22  ;;  %v767_v27 = vpop.eup %766 }
 0x2e8   :  { %v557_v30 = vmul.f32 %v767_v27, %v751_v56  ;;  %v560_v34 = vpack.c.bf16 %v558_v29, %v558_v29 }
 0x2e9   :  { %695 = vmatmul.msk.bf16.vlgmr.msra.gmra.mxu2 %vm122_vm1, %v434_v24 }
 0x2ea   :  { %v559_v35 = vpack.c.bf16 %v557_v30, %v557_v30  ;;  %647 = vmatpush.bf16.msra.mxu0 %v712_v55 }
 0x2f3   :  { %v562_v28 = vpop.permute.xlu0 %561 }
 0x2f4   :  { %v567_v31 = vsel %vm199_vm3, %v562_v28, 0 }
 0x2f5   :  { %v583_v32 = vpop.permute.xlu1 %582  ;;  %576 = vmatpush.bf16.msrb.mxu2 %v567_v31 }
 0x2f6   :  { %v588_v33 = vsel %vm199_vm3, %v583_v32, 0 }
 0x2f7   :  { %597 = vmatpush.bf16.msra.mxu3 %v588_v33 }
 0x2f9   :  { %699 = vmatmul.msk.bf16.vlgmr.msrb.gmra.mxu2 %vm122_vm1, %v559_v35 }
 0x2fa   :  { %700 = vmatmul.msk.bf16.vlgmr.msra.gmra.mxu3 %vm122_vm1, %v560_v34 }
 0x31a   :  { %v328_v36 = vpop.f32.mrf.mxu2 }
 0x31b   :  { %v212_v37 = vpop.f32.mrf.mxu3  ;;  %355 = vrot.lane.b32.xlu0 %v328_v36, %s875_s1 }
 0x31c   :  { %237 = vst.msk [vmem:[#allocation2] sm:$0xff] %vm122_vm1, %v212_v37 }
 0x322   :  { %v330_v38 = vpop.f32.mrf.mxu2 }
 0x323   :  { %v214_v39 = vpop.f32.mrf.mxu3 }
 0x32b   :  { %v233_v40 = vpop.f32.mrf.mxu3 }
 0x32c   :  { %238 = vst.msk [vmem:[#allocation2 + $0x8] sm:$0xff] %vm122_vm1, %v233_v40 }
 0x333   :  { %v235_v41 = vpop.f32.mrf.mxu3 }
 0x33b   :  { %v349_v42 = vpop.f32.mrf.mxu3 }
 0x33c   :  { %357 = vrot.lane.b32.xlu1 %v349_v42, %s875_s1 }
 0x343   :  { %v351_v43 = vpop.f32.mrf.mxu3 }
 0x367   :  { %v474_v44 = vpop.f32.mrf.mxu3 }
 0x368   :  { %482 = vrot.lane.b32.xlu1 %v474_v44, %s887_s20 }
 0x36c   :  { %v453_v45 = vpop.f32.mrf.mxu2 }
 0x36d   :  { %480 = vrot.lane.b32.xlu0 %v453_v45, %s887_s20 }
 0x36f   :  { %v476_v46 = vpop.f32.mrf.mxu3 }
 0x374   :  { %v455_v47 = vpop.f32.mrf.mxu2 }
 0x37c   :  { %v578_v48 = vpop.f32.mrf.mxu2 }
 0x37d   :  { %v599_v49 = vpop.f32.mrf.mxu3  ;;  %605 = vrot.lane.b32.xlu2 %v578_v48, %s888_s21 }
 0x37e   :  { %607 = vrot.lane.b32.xlu0 %v599_v49, %s888_s21 }
 0x384   :  { %v580_v50 = vpop.f32.mrf.mxu2 }
 0x385   :  { %v601_v51 = vpop.f32.mrf.mxu3 }
 0x38d   :  { %v356_v52 = vpop.permute.xlu0 %355 }
 0x38e   :  { %362 = vst.msk [vmem:[#allocation2] sm:$0xff] %vm361_vm4, %v356_v52 }
 0x3ae   :  { %v358_v53 = vpop.permute.xlu1 %357 }
 0x3af   :  { %363 = vst.msk [vmem:[#allocation2 + $0x8] sm:$0xff] %vm361_vm4, %v358_v53 }
 0x3d7   :  { %v606_v58 = vpop.permute.xlu2 %605 }
 0x3da   :  { %v483_v57 = vpop.permute.xlu1 %482 }
 0x3db   :  { %488 = vst.msk [vmem:[#allocation2 + $0x8] sm:$0xff] %vm486_vm5, %v483_v57 }
 0x3df   :  { %v481_v56 = vpop.permute.xlu0 %480 }
 0x3e0   :  { %487 = vst.msk [vmem:[#allocation2] sm:$0xff] %vm486_vm5, %v481_v56 }
 0x3e1   :  { %612 = vst.msk [vmem:[#allocation2] sm:$0xff] %vm611_vm6, %v606_v58 }
 0x3e8   :  { %v614_v60 = vld [vmem:[#allocation2] sm:$0xff] }
 0x3f0   :  { %v608_v59 = vpop.permute.xlu0 %607 }
 0x3f1   :  { %613 = vst.msk [vmem:[#allocation2 + $0x8] sm:$0xff] %vm611_vm6, %v608_v59 }
 0x3f8   :  { %v615_v61 = vld [vmem:[#allocation2 + $0x8] sm:$0xff] }
 0x3f9   :  { %v616_v62 = vpack.c.bf16 %v615_v61, %v614_v60 }
 0x3fb   :  { %709 = vmatmul.msk.bf16.vlgmr.msra.gmra.mxu0 %vm92_vm0, %v616_v62 }
 0x478   :  { %v649_v0 = vpop.f32.mrf.mxu0 }
 0x479   :  { %v650_v1 = vadd.f32 %v735_v63, %v649_v0 }
 0x47b   :  { %654 = vst.msk [vmem:[#allocation9] sm:$0xff] %vm92_vm0, %v650_v1 }
 0x480   :  { %v651_v2 = vpop.f32.mrf.mxu0 }
 0x481   :  { %v652_v3 = vadd.f32 %v735_v63, %v651_v2 }
 0x483   :  { %655 = vst.msk [vmem:[#allocation9 + $0x8] sm:$0xff] %vm92_vm0, %v652_v3 }
 0x484   :  { %668 = dma.vmem_to_hbm [thread:$0]  %s661_s25, 256, %s663_s28, [#allocation5], %s874_s30, %s874_s30, %s875_s1  }
 0x485   :  { %868 = dma.done.wait [#allocation5], 256  }
 0x486   :  { %869 = vsyncadd [#allocation5], 4294967040 }
 0x487   :  { %673 = vsyncpa [#allocation4], 1 }
 0x488   :  { %674 = vsyncpa [#allocation7], 1 }
 0x489   :  { %675 = vsyncpa [#allocation5], 1 }

</bundles_post_ra>
